<compile_context>
chip_gen: v6e
topology: v6e:2x2x1
jax: 0.10.0
libtpu: 0.0.40
codegen_flags: <defaults>
</compile_context>

<pallas_src>
import jax
import jax.numpy as jnp
from jax.experimental import pallas as pl
from jax.experimental.pallas import tpu as pltpu

LANES = 128
MAX_BLOCK_BYTES = 2 * 1024 * 1024   # ~2 MiB of input per block per step
NUM_CORES = 2                       # v7x megacore split; harmless on 1-TC chips


def _make_l1_kernel(block_rows, total_rows, blocks_per_core, grouped_fold,
                    has_tail):
    """All closed-over values are Python ints/bools (no traced constants)."""

    def _fold(diff):
        # Fold block_rows -> accumulator rows with cheap VPU adds (no XLU).
        if grouped_fold:
            return jnp.sum(diff.reshape(-1, 8, LANES), axis=0)
        return jnp.sum(diff, axis=0, keepdims=True)

    def l1_kernel(o_ref, t_ref, out_ref, acc_ref):
        c = pl.program_id(0)            # core (parallel) axis
        i = pl.program_id(1)            # block loop within a core
        g = c * blocks_per_core + i     # logical (unclamped) block index

        @pl.when(i == 0)
        def _():
            acc_ref[...] = jnp.zeros_like(acc_ref)

        diff = jnp.abs(o_ref[...].astype(jnp.float32) -
                       t_ref[...].astype(jnp.float32))

        if has_tail:
            is_full = (g + 1) * block_rows <= total_rows

            @pl.when(is_full)
            def _():
                acc_ref[...] += _fold(diff)

            @pl.when(jnp.logical_not(is_full))
            def _():
                # Boundary (or fully out-of-range core-padding) block: mask
                # rows past the end of the array, then accumulate.
                row = jax.lax.broadcasted_iota(jnp.int32,
                                               (block_rows, LANES), 0)
                keep = (g * block_rows + row) < total_rows
                acc_ref[...] += _fold(jnp.where(keep, diff, 0.0))
        else:
            acc_ref[...] += _fold(diff)

        @pl.when(i == pl.num_programs(1) - 1)
        def _():
            # Single cross-lane/sublane reduce per core, once.
            out_ref[...] = jnp.sum(acc_ref[...]).reshape(1, 1, 1)

    return l1_kernel


def l1_loss(output, target):
    """Equivalent of torch.abs(output - target).mean() -> scalar f32."""
    assert output.shape == target.shape
    n = int(output.size)

    itemsize = int(jnp.dtype(output.dtype).itemsize)
    sub = max(8, 32 // max(itemsize, 1))     # native sublane tile: 8/16/32

    o_flat = output.reshape(-1)   # original dtype; cast happens in-kernel
    t_flat = target.reshape(-1)

    # Zero-copy reshape when n % 128 == 0 (the common case). Otherwise pad
    # only the lane remainder; identical zero padding contributes 0 to |diff|.
    # TODO(synk): fully pad-free lane-tail via manual DMA + flat-index mask.
    rows = -(-n // LANES)
    pad = rows * LANES - n
    if pad:
        o_flat = jnp.pad(o_flat, (0, pad))
        t_flat = jnp.pad(t_flat, (0, pad))

    o2d = o_flat.reshape(rows, LANES)
    t2d = t_flat.reshape(rows, LANES)

    # Block rows: ~2 MiB of HBM traffic per input per step, aligned to the
    # packed sublane tile (dtype-aware so bytes-per-step stays constant).
    max_rows = max(MAX_BLOCK_BYTES // (LANES * itemsize), sub)
    if rows >= sub:
        block_rows = min(max_rows, (rows // sub) * sub)
    else:
        block_rows = rows                    # single tiny block == full array

    num_blocks = -(-rows // block_rows)
    num_cores = NUM_CORES if num_blocks >= NUM_CORES else 1
    blocks_per_core = -(-num_blocks // num_cores)
    has_tail = (num_cores * blocks_per_core * block_rows) != rows
    grouped_fold = (block_rows % 8 == 0)
    acc_rows = 8 if grouped_fold else 1
    last_block = num_blocks - 1

    def in_map(c, i):
        # Clamp so the (at most one) padding block of the core split maps to
        # a valid block; its contribution is zeroed by the in-kernel mask.
        return (jnp.minimum(c * blocks_per_core + i, last_block), 0)

    kernel = _make_l1_kernel(block_rows, rows, blocks_per_core, grouped_fold,
                             has_tail)

    partials = pl.pallas_call(
        kernel,
        out_shape=jax.ShapeDtypeStruct((num_cores, 1, 1), jnp.float32),
        grid_spec=pltpu.PrefetchScalarGridSpec(
            num_scalar_prefetch=0,
            grid=(num_cores, blocks_per_core),
            in_specs=[
                pl.BlockSpec((block_rows, LANES), in_map),
                pl.BlockSpec((block_rows, LANES), in_map),
            ],
            out_specs=pl.BlockSpec((1, 1, 1), lambda c, i: (c, 0, 0)),
            scratch_shapes=[pltpu.VMEM((acc_rows, LANES), jnp.float32)],
        ),
        compiler_params=pltpu.CompilerParams(
            dimension_semantics=("parallel", "arbitrary"),
            vmem_limit_bytes=32 * 1024 * 1024),
    )(o2d, t2d)

    # Per-core partial sums combined here; divide by the *unpadded* count.
    return jnp.sum(partials) / n


if __name__ == "__main__":
    key = jax.random.PRNGKey(0)
    k1, k2, k3, k4 = jax.random.split(key, 4)

    # Optical-flow-style output/target pair (NCHW).
    output = jax.random.normal(k1, (2, 4, 16, 16), dtype=jnp.float32)
    target = jax.random.normal(k2, (2, 4, 16, 16), dtype=jnp.float32)
    loss = l1_loss(output, target)
    jax.block_until_ready(loss)
    ref = jnp.mean(jnp.abs(output - target))
    assert jnp.allclose(loss, ref, atol=1e-6, rtol=1e-5), (loss, ref)

    # Ragged size: exercises the lane remainder, the two-core split, and the
    # gated tail-mask path.
    out2 = jax.random.normal(k3, (3, 5, 7, 11), dtype=jnp.float32)
    tgt2 = jax.random.normal(k4, (3, 5, 7, 11), dtype=jnp.float32)
    loss2 = l1_loss(out2, tgt2)
    jax.block_until_ready(loss2)
    ref2 = jnp.mean(jnp.abs(out2 - tgt2))
    assert jnp.allclose(loss2, ref2, atol=1e-6, rtol=1e-5), (loss2, ref2)

    print("KERNEL_OK")
</pallas_src>

<mosaic_0001>
module attributes {stable_mosaic.version = 11 : i64} {
  func.func @l1_kernel(%arg0: i32, %arg1: i32, %arg2: memref<16x128xf32, #tpu.memory_space<vmem>>, %arg3: memref<16x128xf32, #tpu.memory_space<vmem>>, %arg4: memref<1x1x1xf32, #tpu.memory_space<vmem>>, %arg5: memref<8x128xf32, #tpu.memory_space<vmem>>) attributes {dimension_semantics = [#tpu.dimension_semantics<parallel>, #tpu.dimension_semantics<arbitrary>], iteration_bounds = array<i64: 1, 1>, scalar_prefetch = 0 : i64, scratch_operands = 1 : i64, tpu.core_type = #tpu.core_type<tc>, window_params = [{transform_indices = @transform_0, window_bounds = array<i64: 16, 128>}, {transform_indices = @transform_1, window_bounds = array<i64: 16, 128>}, {transform_indices = @transform_2, window_bounds = array<i64: 1, 1, 1>}]} {
    %c0_i32 = arith.constant 0 : i32
    %0 = arith.cmpi eq, %arg1, %c0_i32 : i32
    %1 = arith.extui %0 : i1 to i32
    %c0_i32_0 = arith.constant 0 : i32
    %2 = arith.cmpi ne, %1, %c0_i32_0 : i32
    scf.if %2 {
      %cst_10 = arith.constant 0.000000e+00 : f32
      %15 = vector.broadcast %cst_10 : f32 to vector<8x128xf32>
      %c0_11 = arith.constant 0 : index
      %c0_12 = arith.constant 0 : index
      %16 = vector.load %arg5[%c0_11, %c0_12] : memref<8x128xf32, #tpu.memory_space<vmem>>, vector<8x128xf32>
      tpu.vector_store %arg5[%c0_11, %c0_12], %15 {strides = array<i32>} : memref<8x128xf32, #tpu.memory_space<vmem>>, vector<8x128xf32>,
    } else {
    }
    %c0 = arith.constant 0 : index
    %c0_1 = arith.constant 0 : index
    %3 = vector.load %arg2[%c0, %c0_1] : memref<16x128xf32, #tpu.memory_space<vmem>>, vector<16x128xf32>
    %c0_2 = arith.constant 0 : index
    %c0_3 = arith.constant 0 : index
    %4 = vector.load %arg3[%c0_2, %c0_3] : memref<16x128xf32, #tpu.memory_space<vmem>>, vector<16x128xf32>
    %5 = arith.subf %3, %4 : vector<16x128xf32>
    %6 = math.absf %5 : vector<16x128xf32>
    %c0_4 = arith.constant 0 : index
    %c0_5 = arith.constant 0 : index
    %7 = vector.load %arg5[%c0_4, %c0_5] : memref<8x128xf32, #tpu.memory_space<vmem>>, vector<8x128xf32>
    %8 = vector.shape_cast %6 : vector<16x128xf32> to vector<2x8x128xf32>
    %cst = arith.constant dense<0.000000e+00> : vector<8x128xf32>
    %9 = vector.multi_reduction <add>, %8, %cst [0] : vector<2x8x128xf32> to vector<8x128xf32>
    %10 = arith.addf %7, %9 : vector<8x128xf32>
    %c0_6 = arith.constant 0 : index
    %c0_7 = arith.constant 0 : index
    %11 = vector.load %arg5[%c0_6, %c0_7] : memref<8x128xf32, #tpu.memory_space<vmem>>, vector<8x128xf32>
    tpu.vector_store %arg5[%c0_6, %c0_7], %10 {strides = array<i32>} : memref<8x128xf32, #tpu.memory_space<vmem>>, vector<8x128xf32>,
    %c0_i32_8 = arith.constant 0 : i32
    %12 = arith.cmpi eq, %arg1, %c0_i32_8 : i32
    %13 = arith.extui %12 : i1 to i32
    %c0_i32_9 = arith.constant 0 : i32
    %14 = arith.cmpi ne, %13, %c0_i32_9 : i32
    scf.if %14 {
      %c0_10 = arith.constant 0 : index
      %c0_11 = arith.constant 0 : index
      %15 = vector.load %arg5[%c0_10, %c0_11] : memref<8x128xf32, #tpu.memory_space<vmem>>, vector<8x128xf32>
      %16 = vector.shape_cast %15 : vector<8x128xf32> to vector<1x8x128xf32>
      %cst_12 = arith.constant dense<0.000000e+00> : vector<1xf32>
      %17 = vector.multi_reduction <add>, %16, %cst_12 [1, 2] : vector<1x8x128xf32> to vector<1xf32>
      %18 = vector.shape_cast %17 : vector<1xf32> to vector<1x1x1xf32>
      %19 = vector.extract %18[0, 0, 0] : f32 from vector<1x1x1xf32>
      %20 = vector.broadcast %19 : f32 to vector<1x1x1xf32>
      %c0_13 = arith.constant 0 : index
      %c0_14 = arith.constant 0 : index
      %c0_15 = arith.constant 0 : index
      %21 = vector.load %arg4[%c0_13, %c0_14, %c0_15] : memref<1x1x1xf32, #tpu.memory_space<vmem>>, vector<1x1x1xf32>
      tpu.vector_store %arg4[%c0_13, %c0_14, %c0_15], %20 {strides = array<i32>} : memref<1x1x1xf32, #tpu.memory_space<vmem>>, vector<1x1x1xf32>,
    } else {
    }
    return
  }
  func.func @transform_0(%arg0: i32, %arg1: i32) -> (i32, i32) {
    %c1_i32 = arith.constant 1 : i32
    %0 = arith.muli %arg0, %c1_i32 : i32
    %1 = arith.addi %0, %arg1 : i32
    %c0_i32 = arith.constant 0 : i32
    %2 = arith.minsi %1, %c0_i32 : i32
    %c0_i32_0 = arith.constant 0 : i32
    %c0_i32_1 = arith.constant 0 : i32
    return %2, %c0_i32_0 : i32, i32
  }
  func.func @transform_1(%arg0: i32, %arg1: i32) -> (i32, i32) {
    %c1_i32 = arith.constant 1 : i32
    %0 = arith.muli %arg0, %c1_i32 : i32
    %1 = arith.addi %0, %arg1 : i32
    %c0_i32 = arith.constant 0 : i32
    %2 = arith.minsi %1, %c0_i32 : i32
    %c0_i32_0 = arith.constant 0 : i32
    %c0_i32_1 = arith.constant 0 : i32
    return %2, %c0_i32_0 : i32, i32
  }
  func.func @transform_2(%arg0: i32, %arg1: i32) -> (i32, i32, i32) {
    %c0_i32 = arith.constant 0 : i32
    %c0_i32_0 = arith.constant 0 : i32
    %c0_i32_1 = arith.constant 0 : i32
    return %arg0, %c0_i32, %c0_i32_0 : i32, i32, i32
  }
}

</mosaic_0001>

<bundles_post_ra>
// kernel: tpu_custom_call.1
= control target key start
LH: loop header
LB: loop body
LE: loop exit
PB: predicated region body
PF: predicated region fallthrough
CT: control target
= control target key end

     0   :  { %7 = vsyncpa [#allocation4], 0  ;;  %s215_s0 = inlined_call_operand.hbm [shape: f32[16,128], index: 0, kind: input, shape index: {}]   ;;  %s216_s1 = inlined_call_operand.hbm [shape: f32[16,128], index: 1, kind: input, shape index: {}]   ;;  %s217_s2 = inlined_call_operand.hbm [shape: f32[1,1,1], index: 2, kind: output, shape index: {}]  }
   0x1   :  { %8 = vsyncpa [#allocation7], 0 }
   0x2   :  { %9 = vsyncpa [#allocation5], 0  ;;  %s186_s9 = smov [#allocation3]  }
   0x3   :  { %s21_s10 = sshll.u32 %s186_s9, 4  ;;  %s22_s10 = int_to_ptr.vmem [resolvable:$true] %s21_s10 }
   0x4   :  { %s128_s11 = scalar_lea.vmem %s22_s10, 256  ;;  %p133_p1 = scmp.lt.s32.totalorder %s22_s10, %s22_s10 }
   0x5   :  { %p129_p0 = scmp.ne.s32.totalorder %s22_s10, %s128_s11  ;;  %p134_p2 = scmp.lt.s32.totalorder %s128_s11, %s128_s11 }
   0x7   :  { %p135_p3 = por %p134_p2, %p133_p1 }
   0x9   :  { %p136_p4 = pnand %p135_p3, %p129_p0 }
   0xb   :  { %139 = shalt.err (!%p136_p4)
}
   0xc   :  { %s187_s12 = smov 128   ;;  %s188_s13 = smov 8  }
   0xd   :  { %27 = dma.hbm_to_vmem [thread:$0]  %s215_s0, 256, %s22_s10, [#allocation4], %s187_s12, %s187_s12, %s188_s13  }
   0xe   :  { %s189_s16 = smov [#allocation6]  }
   0xf   :  { %s39_s17 = sshll.u32 %s189_s16, 4  ;;  %s40_s17 = int_to_ptr.vmem [resolvable:$true] %s39_s17 }
  0x10   :  { %s148_s18 = scalar_lea.vmem %s40_s17, 256  ;;  %p153_p6 = scmp.lt.s32.totalorder %s40_s17, %s40_s17 }
  0x11   :  { %p149_p5 = scmp.ne.s32.totalorder %s40_s17, %s148_s18  ;;  %p154_p7 = scmp.lt.s32.totalorder %s148_s18, %s148_s18 }
  0x13   :  { %p155_p8 = por %p154_p7, %p153_p6 }
  0x15   :  { %p156_p9 = pnand %p155_p8, %p149_p5 }
  0x17   :  { %159 = shalt.err (!%p156_p9)
}
  0x18   :  { %45 = dma.hbm_to_vmem [thread:$0]  %s216_s1, 256, %s40_s17, [#allocation7], %s187_s12, %s187_s12, %s188_s13  }
  0x19   :  { %180 = dma.done.wait [#allocation4], 256  }
  0x1a   :  { %181 = vsyncadd [#allocation4], 4294967040 }
  0x1b   :  { %182 = dma.done.wait [#allocation7], 256  }
  0x1c   :  { %183 = vsyncadd [#allocation7], 4294967040  ;;  %v65_v0 = vld [vmem:[#allocation3] sm:$0xff]  ;;  %v66_v1 = vld [vmem:[#allocation3 + $0x8] sm:$0xff]  ;;  %s190_s0 = smov [#allocation8]   ;;  %vm91_vm0 = vcmask 0  }
  0x1d   :  { %v67_v2 = vld [vmem:[#allocation6] sm:$0xff]  ;;  %v68_v3 = vld [vmem:[#allocation6 + $0x8] sm:$0xff]  ;;  %s99_s1 = sshll.u32 %s190_s0, 4  ;;  %s100_s1 = int_to_ptr.vmem [resolvable:$true] %s99_s1 }
  0x1e   :  { %v69_v4 = vsub.f32 %v65_v0, %v67_v2  ;;  %v70_v5 = vsub.f32 %v66_v1, %v68_v3  ;;  %s160_s22 = scalar_lea.vmem %s100_s1, 16  ;;  %s164_s23 = scalar_lea.vmem %s100_s1, 32 }
  0x1f   :  { %p161_p10 = scmp.ne.s32.totalorder %s100_s1, %s160_s22  ;;  %p165_p11 = scmp.lt.s32.totalorder %s100_s1, %s100_s1 }
  0x20   :  { %v71_v6 = vand.u32 2147483647, %v69_v4  ;;  %v72_v7 = vand.u32 2147483647, %v70_v5  ;;  %p166_p12 = scmp.lt.s32.totalorder %s164_s23, %s160_s22 }
  0x22   :  { %v74_v8 = vadd.f32 %v72_v7, %v71_v6  ;;  %p167_p13 = por %p166_p12, %p165_p11 }
  0x24   :  { %81 = vadd.xlane.f32.xlu0 %v74_v8  ;;  %p168_p0 = pnand %p167_p13, %p161_p10 }
  0xad   :  { %v82_v9 = vpop.xlane.xlu0 %81 }
  0xae   :  { %v83_v10 = vrot.slane %v82_v9, 4 }
  0xb0   :  { %v84_v11 = vadd.f32 %v83_v10, %v82_v9 }
  0xb2   :  { %v85_v12 = vrot.slane %v84_v11, 2 }
  0xb4   :  { %v86_v13 = vadd.f32 %v85_v12, %v84_v11 }
  0xb6   :  { %v87_v14 = vrot.slane %v86_v13, 1 }
  0xb8   :  { %v88_v15 = vadd.f32 %v87_v14, %v86_v13 }
  0xba   :  { %113 = vpush %v88_v15 }
  0xeb   :  { %s114_s21 = spop %113 }
  0xec   :  { %v90_v16 = vstv %s114_s21 }
  0xed   :  { %92 = vst.msk [vmem:[#allocation8] sm:$0x1] %vm91_vm0, %v90_v16 }
  0xee   :  { %171 = shalt.err (!%p168_p0)
}
  0xef   :  { %102 = dma.vmem_to_hbm [thread:$0]  %s100_s1, 16, %s217_s2, [#allocation5]  }
  0xf0   :  { %184 = dma.done.wait [#allocation5], 16  }
  0xf1   :  { %185 = vsyncadd [#allocation5], 4294967280 }
  0xf2   :  { %106 = vsyncpa [#allocation4], 1 }
  0xf3   :  { %107 = vsyncpa [#allocation7], 1 }
  0xf4   :  { %108 = vsyncpa [#allocation5], 1 }

</bundles_post_ra>
